<compile_context>
chip_gen: v5e
topology: v5e:2x2
jax: 0.10.0
libtpu: 0.0.40
codegen_flags: <defaults>
</compile_context>

<pallas_src>
import functools
import math

import jax
import jax.numpy as jnp
from jax.experimental import pallas as pl
from jax.experimental.pallas import tpu as pltpu


# ----------------------------- kernels --------------------------------------


def _highway_kernel_bias(xh_ref, w_ref, b_ref, out_ref):
    # One long-K MXU matmul: (tile_b, 2S) @ (2S, S) -> f32 accumulate.
    acc = jnp.dot(xh_ref[...], w_ref[...], preferred_element_type=jnp.float32)
    acc = acc + b_ref[...]  # (1, S) broadcasts over the batch tile
    out_ref[...] = acc.astype(out_ref.dtype)


def _highway_kernel_nobias(xh_ref, w_ref, out_ref):
    out_ref[...] = jnp.dot(
        xh_ref[...], w_ref[...], preferred_element_type=jnp.float32
    ).astype(out_ref.dtype)


# ----------------------------- wrapper ---------------------------------------


def fuse_highway_weights(weight_x, weight_h):
    """Static parameter prep hoisted out of the kernel: strict-lower mask of
    W_x (torch .tril(-1)) and stacking into a single (2S, S) MXU operand.
    Callers with fixed weights can cache this result across calls."""
    return jnp.concatenate([jnp.tril(weight_x, -1), weight_h], axis=0)


def _pick_tile_b(B, S, itemsize, vmem_budget):
    """Largest batch tile (multiple of 8, capped at 512) such that resident
    (2S, S) weights + double-buffered xh/out tiles fit the VMEM budget."""
    weight_bytes = 2 * (2 * S) * S * itemsize  # allow double-buffer slack
    if B < 8:
        return B
    tile = min(B, 512)
    tile = max(8, (tile // 8) * 8)
    while tile > 8:
        act_bytes = 2 * tile * (3 * S) * itemsize  # xh (2S) + out (S), 2 buffers
        if weight_bytes + act_bytes <= vmem_budget:
            break
        tile //= 2
    return B if B <= tile else tile


@functools.partial(jax.jit, static_argnames=("has_bias",))
def _highway_fused(xh, w_fused, bias2d, *, has_bias):
    B, S2 = xh.shape
    S = S2 // 2
    itemsize = max(jnp.dtype(xh.dtype).itemsize, 4)
    # Conservative budget so resident weights + tiles also fit v7x's 64 MiB VMEM.
    vmem_budget = 40 * 1024 * 1024
    tile_b = _pick_tile_b(B, S, itemsize, vmem_budget)
    grid = (pl.cdiv(B, tile_b),)

    xh_spec = pl.BlockSpec((tile_b, 2 * S), lambda i: (i, 0))
    w_spec = pl.BlockSpec((2 * S, S), lambda i: (0, 0))  # resident across batch tiles
    out_spec = pl.BlockSpec((tile_b, S), lambda i: (i, 0))

    if has_bias:
        kernel = _highway_kernel_bias
        in_specs = [xh_spec, w_spec, pl.BlockSpec((1, S), lambda i: (0, 0))]
        operands = (xh, w_fused, bias2d)
    else:
        kernel = _highway_kernel_nobias
        in_specs = [xh_spec, w_spec]
        operands = (xh, w_fused)

    return pl.pallas_call(
        kernel,
        out_shape=jax.ShapeDtypeStruct((B, S), xh.dtype),
        grid=grid,
        in_specs=in_specs,
        out_specs=out_spec,
        compiler_params=pltpu.CompilerParams(
            # Batch tiles are independent -> shard across v7x's 2 TensorCores.
            dimension_semantics=("parallel",),
            # Above default scoped limits (16 MiB v5e / 32 MiB v6e,v7x) but
            # safely below v7x's 64 MiB physical VMEM.
            vmem_limit_bytes=48 * 1024 * 1024,
        ),
    )(*operands)


def highway_standard(x, h, weight_x, weight_h, bias=None):
    """forward(x, h) = x @ tril(W_x, -1) + h @ W_h (+ bias).

    x, h: (B, S); weight_x, weight_h: (S, S); bias: (S,) or None.
    """
    B, S = x.shape
    w_fused = fuse_highway_weights(weight_x, weight_h).astype(x.dtype)  # (2S, S)
    xh = jnp.concatenate([x, h], axis=1)  # (B, 2S): one long-K matmul operand
    bias2d = None if bias is None else bias.reshape(1, S).astype(x.dtype)
    return _highway_fused(xh, w_fused, bias2d, has_bias=bias is not None)


# ----------------------------- init + test -----------------------------------


def init_params(key, size):
    """Deterministic init mirroring reset_parameters()."""
    k1, k2, k3 = jax.random.split(key, 3)
    # xavier_normal_ on a (size, size) tensor: std = sqrt(2 / (size + size))
    std = math.sqrt(2.0 / (size + size))
    weight_x = std * jax.random.normal(k1, (size, size), dtype=jnp.float32)
    weight_h = std * jax.random.normal(k2, (size, size), dtype=jnp.float32)
    stdv = 1.0 / math.sqrt(size)
    bias = jax.random.uniform(k3, (size,), minval=-stdv, maxval=stdv, dtype=jnp.float32)
    return weight_x, weight_h, bias


if __name__ == "__main__":
    key = jax.random.PRNGKey(0)
    size = 32
    batch = 8

    kx, kh, kp = jax.random.split(key, 3)
    x = jax.random.normal(kx, (batch, size), dtype=jnp.float32)
    h = jax.random.normal(kh, (batch, size), dtype=jnp.float32)
    weight_x, weight_h, bias = init_params(kp, size)

    out = highway_standard(x, h, weight_x, weight_h, bias)
    out = jax.block_until_ready(out)

    # Reference check in plain JAX.
    ref = x @ jnp.tril(weight_x, -1) + h @ weight_h + bias
    assert out.shape == (batch, size)
    assert jnp.allclose(out, ref, atol=1e-5, rtol=1e-5)

    # Also exercise the bias=None path.
    out_nb = jax.block_until_ready(highway_standard(x, h, weight_x, weight_h, None))
    ref_nb = x @ jnp.tril(weight_x, -1) + h @ weight_h
    assert jnp.allclose(out_nb, ref_nb, atol=1e-5, rtol=1e-5)

    print("KERNEL_OK")
</pallas_src>

<mosaic_0001>
module attributes {stable_mosaic.version = 11 : i64} {
  func.func @_highway_kernel_bias(%arg0: i32, %arg1: memref<8x64xf32, #tpu.memory_space<vmem>>, %arg2: memref<64x32xf32, #tpu.memory_space<vmem>>, %arg3: memref<1x32xf32, #tpu.memory_space<vmem>>, %arg4: memref<8x32xf32, #tpu.memory_space<vmem>>) attributes {dimension_semantics = [#tpu.dimension_semantics<parallel>], iteration_bounds = array<i64: 1>, scalar_prefetch = 0 : i64, scratch_operands = 0 : i64, tpu.core_type = #tpu.core_type<tc>, window_params = [{transform_indices = @transform_0, window_bounds = array<i64: 8, 64>}, {pipeline_mode = #tpu.pipeline_mode<synchronous>, transform_indices = @transform_1, window_bounds = array<i64: 64, 32>}, {pipeline_mode = #tpu.pipeline_mode<synchronous>, transform_indices = @transform_2, window_bounds = array<i64: 1, 32>}, {transform_indices = @transform_3, window_bounds = array<i64: 8, 32>}]} {
    %c0 = arith.constant 0 : index
    %c0_0 = arith.constant 0 : index
    %0 = vector.load %arg1[%c0, %c0_0] : memref<8x64xf32, #tpu.memory_space<vmem>>, vector<8x64xf32>
    %c0_1 = arith.constant 0 : index
    %c0_2 = arith.constant 0 : index
    %1 = vector.load %arg2[%c0_1, %c0_2] : memref<64x32xf32, #tpu.memory_space<vmem>>, vector<64x32xf32>
    %cst = arith.constant dense<0.000000e+00> : vector<8x32xf32>
    %2 = tpu.matmul %0, %1, %cst {dimension_numbers = #tpu.dot_dimension_numbers<[1], [0], [0], [1], [0, 0, 1, 1], [], []>} : vector<8x64xf32>, vector<64x32xf32>, vector<8x32xf32> -> vector<8x32xf32>
    %c0_3 = arith.constant 0 : index
    %c0_4 = arith.constant 0 : index
    %3 = vector.load %arg3[%c0_3, %c0_4] : memref<1x32xf32, #tpu.memory_space<vmem>>, vector<1x32xf32>
    %4 = vector.broadcast %3 : vector<1x32xf32> to vector<8x32xf32>
    %5 = arith.addf %2, %4 : vector<8x32xf32>
    %c0_5 = arith.constant 0 : index
    %c0_6 = arith.constant 0 : index
    %6 = vector.load %arg4[%c0_5, %c0_6] : memref<8x32xf32, #tpu.memory_space<vmem>>, vector<8x32xf32>
    tpu.vector_store %arg4[%c0_5, %c0_6], %5 {strides = array<i32>} : memref<8x32xf32, #tpu.memory_space<vmem>>, vector<8x32xf32>,
    return
  }
  func.func @transform_0(%arg0: i32) -> (i32, i32) {
    %c0_i32 = arith.constant 0 : i32
    %c0_i32_0 = arith.constant 0 : i32
    return %arg0, %c0_i32 : i32, i32
  }
  func.func @transform_1(%arg0: i32) -> (i32, i32) {
    %c0_i32 = arith.constant 0 : i32
    %c0_i32_0 = arith.constant 0 : i32
    %c0_i32_1 = arith.constant 0 : i32
    return %c0_i32, %c0_i32_0 : i32, i32
  }
  func.func @transform_2(%arg0: i32) -> (i32, i32) {
    %c0_i32 = arith.constant 0 : i32
    %c0_i32_0 = arith.constant 0 : i32
    %c0_i32_1 = arith.constant 0 : i32
    return %c0_i32, %c0_i32_0 : i32, i32
  }
  func.func @transform_3(%arg0: i32) -> (i32, i32) {
    %c0_i32 = arith.constant 0 : i32
    %c0_i32_0 = arith.constant 0 : i32
    return %arg0, %c0_i32 : i32, i32
  }
}

</mosaic_0001>

<bundles_post_ra>
// kernel: _highway_fused.1
= control target key start
LH: loop header
LB: loop body
LE: loop exit
PB: predicated region body
PF: predicated region fallthrough
CT: control target
= control target key end

     0   :  { %s153_s0 = inlined_call_operand.vmem [shape: f32[8,64], index: 0, kind: input, shape index: {}]   ;;  %s154_s1 = inlined_call_operand.vmem [shape: f32[64,32], index: 1, kind: input, shape index: {}]   ;;  %s155_s2 = inlined_call_operand.vmem [shape: f32[1,32], index: 2, kind: input, shape index: {}]   ;;  %s156_s3 = inlined_call_operand.hbm [shape: f32[8,32], index: 3, kind: output, shape index: {}]  }
   0x1   :  { %v23_v0 = vld [vmem:[%s154_s1 + $0x38] sm:$0xff]  ;;  %v22_v1 = vld [vmem:[%s154_s1 + $0x30] sm:$0xff]  ;;  %v21_v2 = vld [vmem:[%s154_s1 + $0x28] sm:$0xff] }
   0x2   :  { %40 = vmatpush.msra.mxu0 %v23_v0 }
   0x4   :  { %41 = vmatpush.msra.mxu0 %v22_v1 }
   0x5   :  { %8 = vsyncpa [#allocation3], 0  ;;  %v20_v3 = vld [vmem:[%s154_s1 + $0x20] sm:$0xff]  ;;  %v19_v4 = vld [vmem:[%s154_s1 + $0x18] sm:$0xff]  ;;  %vm28_vm0 = vcmask 523264   ;;  %s99_s5 = smov [#allocation2]  }
   0x6   :  { %42 = vmatpush.msra.mxu0 %v21_v2  ;;  %v18_v5 = vld [vmem:[%s154_s1 + $0x10] sm:$0xff]  ;;  %v17_v6 = vld [vmem:[%s154_s1 + $0x8] sm:$0xff]  ;;  %v16_v7 = vld [vmem:[%s154_s1] sm:$0xff]  ;;  %s59_s6 = sshll.u32 %s99_s5, 4  ;;  %s61_s9 = sshll.u32 %s156_s3, 4  ;;  %vm52_vm1 = vcmask 261120   ;;  %s60_s6 = int_to_ptr.vmem [resolvable:$true] %s59_s6  ;;  %s62_s9 = int_to_ptr.hbm [resolvable:$true] %s61_s9 }
   0x7   :  { %v15_v8 = vld [vmem:[%s153_s0] sm:$0xff] }
   0x8   :  { %43 = vmatpush.msra.mxu0 %v20_v3  ;;  %v72_v9 = vld [vmem:[%s155_s2] ss:$0 sm:$0xff] }
   0xa   :  { %44 = vmatpush.msra.mxu0 %v19_v4 }
   0xc   :  { %45 = vmatpush.msra.mxu0 %v18_v5 }
   0xe   :  { %46 = vmatpush.msra.mxu0 %v17_v6 }
  0x10   :  { %47 = vmatpush.msra.mxu0 %v16_v7 }
  0x11   :  { %70 = vmatmul.msk.f32.vlgmr.msra.gmra.mxu0 %vm28_vm0, %v15_v8 }
  0x8e   :  { %v49_v10 = vpop.f32.mrf.mxu0 }
  0x8f   :  { %v50_v11 = vadd.f32 %v72_v9, %v49_v10 }
  0x91   :  { %53 = vst.msk [vmem:[#allocation2] sm:$0xff] %vm52_vm1, %v50_v11 }
  0x92   :  { %64 = dma.vmem_to_hbm [thread:$0]  %s60_s6, 128, %s62_s9, [#allocation3]  }
  0x93   :  { %97 = dma.done.wait [#allocation3], 128  }
  0x94   :  { %98 = vsyncadd [#allocation3], 4294967168 }
  0x95   :  { %69 = vsyncpa [#allocation3], 1 }

</bundles_post_ra>
